<compile_context>
chip_gen: v7x
topology: tpu7x:2x2x1
jax: 0.10.0
libtpu: 0.0.40
codegen_flags: <defaults>
</compile_context>

<pallas_src>
import functools

import jax
import jax.numpy as jnp
from jax.experimental import pallas as pl
from jax.experimental.pallas import tpu as pltpu

C_IN = 128
C_HID = 128
NUM_PARTS = 50
C_OUT_PAD = 56   # NUM_PARTS padded up to a multiple of 8 (sublane tile)


def _seg_classifier_kernel(x_ref, w1s_ref, shift_ref, w2_ref, b2_ref, o_ref):
    # Channels-first tile: channels on sublanes, points on lanes.
    #   x_ref:     (C_IN, tn)        input points tile
    #   w1s_ref:   (C_HID, C_IN)     fc1 weight with BN scale folded in
    #   shift_ref: (C_HID, 1)        folded BN shift (broadcast over lanes)
    #   w2_ref:    (C_OUT_PAD, C_HID) fc2 weight, zero-padded rows 50..55
    #   b2_ref:    (C_OUT_PAD, 1)    fc2 bias, zero-padded
    #   o_ref:     (C_OUT_PAD, tn)   padded output tile
    x = x_ref[...]

    # fc1 (1x1 conv == matmul over channels) with BN scale pre-folded.
    h = jnp.dot(w1s_ref[...], x, preferred_element_type=jnp.float32)
    h = jnp.maximum(h + shift_ref[...], 0.0)

    # Dropout(p=0.5) is identity in eval mode.
    # TODO(synk): training-mode dropout (random mask + 1/(1-p) scale) not implemented.

    # fc2 (1x1 conv == matmul over channels) with bias.
    o = jnp.dot(w2_ref[...], h, preferred_element_type=jnp.float32) + b2_ref[...]
    o_ref[...] = o.astype(o_ref.dtype)


@functools.partial(jax.jit, static_argnames=("tn",))
def pointnet2_seg_classifier(feat, params, *, tn=1024):
    """feat: (B, 128, N) float32  ->  (B, num_parts, N) float32."""
    B, C, N = feat.shape
    assert C == C_IN

    eps = 1e-5
    scale = params["bn_gamma"] / jnp.sqrt(params["bn_var"] + eps)   # (128,)
    shift = params["bn_beta"] - params["bn_mean"] * scale           # (128,)

    # fc1 weight (C_out, C_in, 1) -> (C_out, C_in), BN scale folded per out-channel.
    w1 = params["w1"][:, :, 0]
    w1s = (w1 * scale[:, None]).astype(jnp.float32)                  # (128, 128)
    shift2d = shift.reshape(C_HID, 1).astype(jnp.float32)            # (128, 1)

    # fc2 weight (num_parts, C_hid, 1) -> zero-pad out-channels 50 -> 56.
    w2 = params["w2"][:, :, 0]                                       # (50, 128)
    w2_pad = jnp.zeros((C_OUT_PAD, C_HID), jnp.float32).at[:NUM_PARTS].set(w2)
    b2_pad = jnp.zeros((C_OUT_PAD, 1), jnp.float32).at[:NUM_PARTS, 0].set(
        params["b2"])

    x = feat.astype(jnp.float32)

    # Point tile: full N if small, otherwise tn lanes (multiple of 128).
    tn_eff = int(N) if N <= tn else int(tn)
    grid_n = pl.cdiv(N, tn_eff)

    out_pad = pl.pallas_call(
        _seg_classifier_kernel,
        out_shape=jax.ShapeDtypeStruct((B, C_OUT_PAD, N), jnp.float32),
        grid_spec=pltpu.PrefetchScalarGridSpec(
            num_scalar_prefetch=0,
            grid=(B, grid_n),
            in_specs=[
                pl.BlockSpec((None, C_IN, tn_eff), lambda b, j: (b, 0, j)),  # x
                pl.BlockSpec((C_HID, C_IN), lambda b, j: (0, 0)),            # w1s
                pl.BlockSpec((C_HID, 1), lambda b, j: (0, 0)),               # shift
                pl.BlockSpec((C_OUT_PAD, C_HID), lambda b, j: (0, 0)),       # w2
                pl.BlockSpec((C_OUT_PAD, 1), lambda b, j: (0, 0)),           # b2
            ],
            out_specs=pl.BlockSpec((None, C_OUT_PAD, tn_eff),
                                   lambda b, j: (b, 0, j)),
        ),
        compiler_params=pltpu.CompilerParams(
            dimension_semantics=("parallel", "parallel")),
    )(x, w1s, shift2d, w2_pad, b2_pad)

    # Drop the 6 padded output channels (only wrapper-side pass; touches just
    # the small output tensor).
    return out_pad[:, :NUM_PARTS, :]


def init_params(key):
    ks = jax.random.split(key, 4)
    params = {
        # Conv1d(128,128,k=1): bias=False because bn=True in pt_utils.Conv1d
        "w1": 0.05 * jax.random.normal(ks[0], (C_HID, C_IN, 1), jnp.float32),
        "bn_gamma": 1.0 + 0.01 * jax.random.normal(ks[1], (C_HID,), jnp.float32),
        "bn_beta": jnp.zeros((C_HID,), jnp.float32),
        "bn_mean": 0.01 * jax.random.normal(ks[2], (C_HID,), jnp.float32),
        "bn_var": jnp.ones((C_HID,), jnp.float32),
        # Conv1d(128, num_parts, k=1) with bias
        "w2": 0.05 * jax.random.normal(ks[3], (NUM_PARTS, C_HID, 1), jnp.float32),
        "b2": jnp.zeros((NUM_PARTS,), jnp.float32),
    }
    return params


def _reference(feat, params):
    """Pure-JAX reference matching the PyTorch eval-mode forward."""
    eps = 1e-5
    scale = params["bn_gamma"] / jnp.sqrt(params["bn_var"] + eps)
    shift = params["bn_beta"] - params["bn_mean"] * scale
    w1 = params["w1"][:, :, 0]                               # (128, 128)
    w2 = params["w2"][:, :, 0]                               # (50, 128)
    h = jnp.einsum("oc,bcn->bon", w1, feat)
    h = jnp.maximum(h * scale[None, :, None] + shift[None, :, None], 0.0)
    o = jnp.einsum("oc,bcn->bon", w2, h) + params["b2"][None, :, None]
    return o                                                 # (B, num_parts, N)


if __name__ == "__main__":
    key = jax.random.PRNGKey(0)
    pkey, xkey = jax.random.split(key)
    params = init_params(pkey)

    B, N = 2, 256
    feat = jax.random.normal(xkey, (B, C_IN, N), jnp.float32)

    out = pointnet2_seg_classifier(feat, params)
    out = jax.block_until_ready(out)

    ref = _reference(feat, params)
    assert out.shape == (B, NUM_PARTS, N), out.shape
    assert jnp.allclose(out, ref, atol=1e-4, rtol=1e-4), float(
        jnp.max(jnp.abs(out - ref)))
    print("KERNEL_OK")
</pallas_src>

<mosaic_0001>
module attributes {stable_mosaic.version = 11 : i64} {
  func.func @_seg_classifier_kernel(%arg0: i32, %arg1: i32, %arg2: memref<1x128x256xf32, #tpu.memory_space<vmem>>, %arg3: memref<128x128xf32, #tpu.memory_space<vmem>>, %arg4: memref<128x1xf32, #tpu.memory_space<vmem>>, %arg5: memref<56x128xf32, #tpu.memory_space<vmem>>, %arg6: memref<56x1xf32, #tpu.memory_space<vmem>>, %arg7: memref<1x56x256xf32, #tpu.memory_space<vmem>>) attributes {dimension_semantics = [#tpu.dimension_semantics<parallel>, #tpu.dimension_semantics<parallel>], iteration_bounds = array<i64: 2, 1>, scalar_prefetch = 0 : i64, scratch_operands = 0 : i64, tpu.core_type = #tpu.core_type<tc>, window_params = [{transform_indices = @transform_0, window_bounds = array<i64: 1, 128, 256>}, {pipeline_mode = #tpu.pipeline_mode<synchronous>, transform_indices = @transform_1, window_bounds = array<i64: 128, 128>}, {pipeline_mode = #tpu.pipeline_mode<synchronous>, transform_indices = @transform_2, window_bounds = array<i64: 128, 1>}, {pipeline_mode = #tpu.pipeline_mode<synchronous>, transform_indices = @transform_3, window_bounds = array<i64: 56, 128>}, {pipeline_mode = #tpu.pipeline_mode<synchronous>, transform_indices = @transform_4, window_bounds = array<i64: 56, 1>}, {transform_indices = @transform_5, window_bounds = array<i64: 1, 56, 256>}]} {
    %c0 = arith.constant 0 : index
    %c0_0 = arith.constant 0 : index
    %c0_1 = arith.constant 0 : index
    %0 = vector.load %arg2[%c0, %c0_0, %c0_1] : memref<1x128x256xf32, #tpu.memory_space<vmem>>, vector<1x128x256xf32>
    %1 = vector.shape_cast %0 : vector<1x128x256xf32> to vector<128x256xf32>
    %c0_2 = arith.constant 0 : index
    %c0_3 = arith.constant 0 : index
    %2 = vector.load %arg3[%c0_2, %c0_3] : memref<128x128xf32, #tpu.memory_space<vmem>>, vector<128x128xf32>
    %cst = arith.constant dense<0.000000e+00> : vector<128x256xf32>
    %3 = tpu.matmul %2, %1, %cst {dimension_numbers = #tpu.dot_dimension_numbers<[1], [0], [0], [1], [0, 0, 1, 1], [], []>} : vector<128x128xf32>, vector<128x256xf32>, vector<128x256xf32> -> vector<128x256xf32>
    %c0_4 = arith.constant 0 : index
    %c0_5 = arith.constant 0 : index
    %4 = vector.load %arg4[%c0_4, %c0_5] : memref<128x1xf32, #tpu.memory_space<vmem>>, vector<128x1xf32>
    %5 = vector.broadcast %4 : vector<128x1xf32> to vector<128x256xf32>
    %6 = arith.addf %3, %5 : vector<128x256xf32>
    %cst_6 = arith.constant 0.000000e+00 : f32
    %7 = vector.broadcast %cst_6 : f32 to vector<128x256xf32>
    %8 = arith.maximumf %6, %7 : vector<128x256xf32>
    %c0_7 = arith.constant 0 : index
    %c0_8 = arith.constant 0 : index
    %9 = vector.load %arg5[%c0_7, %c0_8] : memref<56x128xf32, #tpu.memory_space<vmem>>, vector<56x128xf32>
    %cst_9 = arith.constant dense<0.000000e+00> : vector<56x256xf32>
    %10 = tpu.matmul %9, %8, %cst_9 {dimension_numbers = #tpu.dot_dimension_numbers<[1], [0], [0], [1], [0, 0, 1, 1], [], []>} : vector<56x128xf32>, vector<128x256xf32>, vector<56x256xf32> -> vector<56x256xf32>
    %c0_10 = arith.constant 0 : index
    %c0_11 = arith.constant 0 : index
    %11 = vector.load %arg6[%c0_10, %c0_11] : memref<56x1xf32, #tpu.memory_space<vmem>>, vector<56x1xf32>
    %12 = vector.broadcast %11 : vector<56x1xf32> to vector<56x256xf32>
    %13 = arith.addf %10, %12 : vector<56x256xf32>
    %c0_12 = arith.constant 0 : index
    %c0_13 = arith.constant 0 : index
    %c0_14 = arith.constant 0 : index
    %14 = vector.load %arg7[%c0_12, %c0_13, %c0_14] : memref<1x56x256xf32, #tpu.memory_space<vmem>>, vector<1x56x256xf32>
    %15 = vector.shape_cast %14 : vector<1x56x256xf32> to vector<56x256xf32>
    %16 = vector.shape_cast %13 : vector<56x256xf32> to vector<1x56x256xf32>
    tpu.vector_store %arg7[%c0_12, %c0_13, %c0_14], %16 {strides = array<i32>} : memref<1x56x256xf32, #tpu.memory_space<vmem>>, vector<1x56x256xf32>,
    return
  }
  func.func @transform_0(%arg0: i32, %arg1: i32) -> (i32, i32, i32) {
    %c0_i32 = arith.constant 0 : i32
    %c0_i32_0 = arith.constant 0 : i32
    return %arg0, %c0_i32, %arg1 : i32, i32, i32
  }
  func.func @transform_1(%arg0: i32, %arg1: i32) -> (i32, i32) {
    %c0_i32 = arith.constant 0 : i32
    %c0_i32_0 = arith.constant 0 : i32
    %c0_i32_1 = arith.constant 0 : i32
    return %c0_i32, %c0_i32_0 : i32, i32
  }
  func.func @transform_2(%arg0: i32, %arg1: i32) -> (i32, i32) {
    %c0_i32 = arith.constant 0 : i32
    %c0_i32_0 = arith.constant 0 : i32
    %c0_i32_1 = arith.constant 0 : i32
    return %c0_i32, %c0_i32_0 : i32, i32
  }
  func.func @transform_3(%arg0: i32, %arg1: i32) -> (i32, i32) {
    %c0_i32 = arith.constant 0 : i32
    %c0_i32_0 = arith.constant 0 : i32
    %c0_i32_1 = arith.constant 0 : i32
    return %c0_i32, %c0_i32_0 : i32, i32
  }
  func.func @transform_4(%arg0: i32, %arg1: i32) -> (i32, i32) {
    %c0_i32 = arith.constant 0 : i32
    %c0_i32_0 = arith.constant 0 : i32
    %c0_i32_1 = arith.constant 0 : i32
    return %c0_i32, %c0_i32_0 : i32, i32
  }
  func.func @transform_5(%arg0: i32, %arg1: i32) -> (i32, i32, i32) {
    %c0_i32 = arith.constant 0 : i32
    %c0_i32_0 = arith.constant 0 : i32
    return %arg0, %c0_i32, %arg1 : i32, i32, i32
  }
}

</mosaic_0001>

<bundles_post_ra>
// kernel: pointnet2_seg_classifier.1
= control target key start
LH: loop header
LB: loop body
LE: loop exit
PB: predicated region body
PF: predicated region fallthrough
CT: control target
= control target key end

     0   :  { %s1018_s18 = smov 0   ;;  %s1020_s19 = smov 0   ;;  %s1266_s0 = inlined_call_operand.vmem [shape: f32[2,128,256], index: 0, kind: input, shape index: {}]   ;;  %s1267_s1 = inlined_call_operand.vmem [shape: f32[128,128], index: 1, kind: input, shape index: {}]   ;;  %s1268_s2 = inlined_call_operand.vmem [shape: f32[128,1], index: 2, kind: input, shape index: {}]   ;;  %s1269_s3 = inlined_call_operand.vmem [shape: f32[56,128], index: 3, kind: input, shape index: {}]   ;;  %s1270_s4 = inlined_call_operand.vmem [shape: f32[56,1], index: 4, kind: input, shape index: {}]   ;;  %s1271_s5 = inlined_call_operand.vmem [shape: f32[2,56,256], index: 5, kind: output, shape index: {}]  }
   0x1   :  { %s1022_s20 = smov 0  }
   0x2 LB: > { %s27_s21 = sadd.s32 1, %s980_s19  ;;  %p862_p0 = scmp.ge.s32.totalorder %s984_s20, 1  ;;  %s984_s20 = sphi %s1022_s20, %s15_s20   ;;  %s980_s19 = sphi %s1020_s19, %s1273_s19   ;;  %s976_s18 = sphi %s1018_s18, %s1272_s18  }
   0x3   : > { %p29_p1 = scmp.ge.s32.totalorder %s27_s21, 2  ;;  %p208_p2 = scmp.lt.s32.totalorder %s984_s20, 3 }
   0x5   : > { %s1275_s21 = smov (%p29_p1, %s27_s21), 0  ;;  %p209_p3 = pnand %p862_p0, %p208_p2 }
   0x6   : > { %p245_p4 = scmp.lt.s32.totalorder (!%p209_p3), %s976_s18, 1  ;;  %v986_v0 = vmov (!%p209_p3), 0.0   ;;  %v987_v1 = vmov (!%p209_p3), 0   ;;  %v312_v2 = vld [vmem:[%s1268_s2] sm:$0xff] (!%p209_p3)  ;;  %v313_v3 = vld [vmem:[%s1268_s2 + $0x8] sm:$0xff] (!%p209_p3)  ;;  %v314_v29 = vld [vmem:[%s1268_s2 + $0x10] sm:$0xff] (!%p209_p3) }
   0x7   : > { %212 = sbr.rel (%p209_p3) target bundleno = 575 (0x23f), region = 40  ;;  %472 = vmatprep.mubr.f32.mxu0 (!%p209_p3), %v986_v0  ;;  %960 = vset.pattern.permute.xlu0 (!%p209_p3), %v987_v1  ;;  %v316_v30 = vld [vmem:[%s1268_s2 + $0x20] sm:$0xff] (!%p209_p3)  ;;  %v315_v32 = vld [vmem:[%s1268_s2 + $0x18] sm:$0xff] (!%p209_p3)  ;;  %v318_v36 = vld [vmem:[%s1268_s2 + $0x30] sm:$0xff] (!%p209_p3) }
   0x8   : > { %961 = vset.pattern.permute.xlu1 (!%p209_p3), %v987_v1  ;;  %714 = vmatprep.mubr.f32.mxu1 (!%p209_p3), %v986_v0  ;;  %v317_v40 = vld [vmem:[%s1268_s2 + $0x28] sm:$0xff] (!%p209_p3)  ;;  %v320_v44 = vld [vmem:[%s1268_s2 + $0x40] sm:$0xff] (!%p209_p3)  ;;  %v319_v48 = vld [vmem:[%s1268_s2 + $0x38] sm:$0xff] (!%p209_p3) }
   0x9   : > { %330 = vperm.xlu0 (!%p209_p3), %960, %v312_v2   ;;  %340 = vperm.xlu1 (!%p209_p3), %961, %v314_v29   ;;  %v322_v52 = vld [vmem:[%s1268_s2 + $0x50] sm:$0xff] (!%p209_p3)  ;;  %v321_v56 = vld [vmem:[%s1268_s2 + $0x48] sm:$0xff] (!%p209_p3)  ;;  %v324_v60 = vld [vmem:[%s1268_s2 + $0x60] sm:$0xff] (!%p209_p3) }
   0xa   : > { %v323_v62 = vld [vmem:[%s1268_s2 + $0x58] sm:$0xff] (!%p209_p3)  ;;  %v326_v63 = vld [vmem:[%s1268_s2 + $0x70] sm:$0xff] (!%p209_p3)  ;;  %v296_v1 = vld [vmem:[%s1267_s1] sm:$0xff] (!%p209_p3) }
   0xb   : > { %v325_v2 = vld [vmem:[%s1268_s2 + $0x68] sm:$0xff] (!%p209_p3) }
   0xd   : > { %335 = vperm.xlu0 (!%p209_p3), %960, %v313_v3   ;;  %345 = vperm.xlu1 (!%p209_p3), %961, %v315_v32   ;;  %v608_v3 = vld [vmem:[%s1270_s4] sm:$0xff] (!%p209_p3) }
   0xe   : > { %s1277_s18 = smov (!%p245_p4, %s976_s18), 1 }
   0xf   : > { %s868_s22 = sshll.u32 %s1277_s18, 8  ;;  %s933_s9 = smul.u32 112, %s1277_s18 }
  0x10   : > { %s1044_s25 = scalar_lea.vmem %s1266_s0, %s868_s22 }
  0x11   : > { %v265_v4 = vld [vmem:[%s1044_s25 + $0x8] sm:$0xff]  ;;  %v267_v5 = vld [vmem:[%s1044_s25 + $0x18] sm:$0xff]  ;;  %v264_v6 = vld [vmem:[%s1044_s25] sm:$0xff]  ;;  %350 = vperm.xlu0 %960, %v316_v30   ;;  %355 = vperm.xlu1 %961, %v317_v40   ;;  %s1241_s12 = scalar_lea.vmem %s1271_s5, %s933_s9 }
  0x12   : > { %v869_v7 = vpack.c.bf16 %v267_v5, %v265_v4  ;;  %v266_v8 = vld [vmem:[%s1044_s25 + $0x10] sm:$0xff]  ;;  %v269_v9 = vld [vmem:[%s1044_s25 + $0x28] sm:$0xff]  ;;  %v271_v10 = vld [vmem:[%s1044_s25 + $0x38] sm:$0xff] }
  0x13   : > { %v871_v11 = vpack.c.bf16 %v266_v8, %v264_v6  ;;  %v873_v12 = vpack.c.bf16 %v271_v10, %v269_v9  ;;  %v268_v13 = vld [vmem:[%s1044_s25 + $0x20] sm:$0xff]  ;;  %v270_v14 = vld [vmem:[%s1044_s25 + $0x30] sm:$0xff]  ;;  %v273_v15 = vld [vmem:[%s1044_s25 + $0x48] sm:$0xff] }
  0x14   : > { %870 = vmatprep.subr.bf16.mxu0 %v869_v7  ;;  %v275_v16 = vld [vmem:[%s1044_s25 + $0x58] sm:$0xff]  ;;  %v875_v17 = vpack.c.bf16 %v270_v14, %v268_v13  ;;  %v272_v19 = vld [vmem:[%s1044_s25 + $0x40] sm:$0xff]  ;;  %v274_v20 = vld [vmem:[%s1044_s25 + $0x50] sm:$0xff] }
  0x15   : > { %872 = vmatpush1.bf16.msra.mxu0 %v871_v11  ;;  %v877_v18 = vpack.c.bf16 %v275_v16, %v273_v15  ;;  %v277_v21 = vld [vmem:[%s1044_s25 + $0x68] sm:$0xff]  ;;  %v279_v22 = vld [vmem:[%s1044_s25 + $0x78] sm:$0xff]  ;;  %v879_v23 = vpack.c.bf16 %v274_v20, %v272_v19  ;;  %v276_v25 = vld [vmem:[%s1044_s25 + $0x60] sm:$0xff]  ;;  %360 = vperm.xlu0 %960, %v318_v36  }
  0x16   : > { %874 = vmatprep.subr.bf16.mxu0 %v873_v12  ;;  %v881_v24 = vpack.c.bf16 %v279_v22, %v277_v21  ;;  %v278_v26 = vld [vmem:[%s1044_s25 + $0x70] sm:$0xff]  ;;  %v281_v27 = vld [vmem:[%s1044_s25 + $0x88] sm:$0xff]  ;;  %v283_v28 = vld [vmem:[%s1044_s25 + $0x98] sm:$0xff]  ;;  %365 = vperm.xlu1 %961, %v319_v48  }
  0x17   : > { %v883_v31 = vpack.c.bf16 %v278_v26, %v276_v25  ;;  %v885_v33 = vpack.c.bf16 %v283_v28, %v281_v27  ;;  %v280_v34 = vld [vmem:[%s1044_s25 + $0x80] sm:$0xff]  ;;  %v282_v35 = vld [vmem:[%s1044_s25 + $0x90] sm:$0xff]  ;;  %v285_v37 = vld [vmem:[%s1044_s25 + $0xa8] sm:$0xff] }
  0x18   : > { %v287_v38 = vld [vmem:[%s1044_s25 + $0xb8] sm:$0xff]  ;;  %v887_v39 = vpack.c.bf16 %v282_v35, %v280_v34  ;;  %v284_v42 = vld [vmem:[%s1044_s25 + $0xa0] sm:$0xff]  ;;  %v286_v43 = vld [vmem:[%s1044_s25 + $0xb0] sm:$0xff] }
  0x19   : > { %876 = vmatpush1.bf16.msra.mxu0 %v875_v17  ;;  %v889_v41 = vpack.c.bf16 %v287_v38, %v285_v37  ;;  %v289_v45 = vld [vmem:[%s1044_s25 + $0xc8] sm:$0xff]  ;;  %v291_v46 = vld [vmem:[%s1044_s25 + $0xd8] sm:$0xff]  ;;  %v891_v47 = vpack.c.bf16 %v286_v43, %v284_v42  ;;  %370 = vperm.xlu0 %960, %v320_v44   ;;  %v288_v50 = vld [vmem:[%s1044_s25 + $0xc0] sm:$0xff] }
  0x1a   : > { %878 = vmatprep.subr.bf16.mxu0 %v877_v18  ;;  %v893_v49 = vpack.c.bf16 %v291_v46, %v289_v45  ;;  %v290_v51 = vld [vmem:[%s1044_s25 + $0xd0] sm:$0xff]  ;;  %v293_v53 = vld [vmem:[%s1044_s25 + $0xe8] sm:$0xff]  ;;  %v295_v54 = vld [vmem:[%s1044_s25 + $0xf8] sm:$0xff]  ;;  %375 = vperm.xlu1 %961, %v321_v56  }
  0x1b   : > { %v895_v55 = vpack.c.bf16 %v290_v51, %v288_v50  ;;  %v897_v57 = vpack.c.bf16 %v295_v54, %v293_v53  ;;  %v292_v58 = vld [vmem:[%s1044_s25 + $0xe0] sm:$0xff]  ;;  %v294_v59 = vld [vmem:[%s1044_s25 + $0xf0] sm:$0xff]  ;;  %v297_v4 = vld [vmem:[%s1267_s1 + $0x8] sm:$0xff] }
  0x1c   : > { %v899_v61 = vpack.c.bf16 %v294_v59, %v292_v58  ;;  %v327_v5 = vld [vmem:[%s1268_s2 + $0x78] sm:$0xff]  ;;  %v610_v6 = vld [vmem:[%s1270_s4 + $0x10] sm:$0xff]  ;;  %v609_v8 = vld [vmem:[%s1270_s4 + $0x8] sm:$0xff] }
  0x1d   : > { %880 = vmatpush1.bf16.msra.mxu0 %v879_v23  ;;  %380 = vperm.xlu0 %960, %v322_v52   ;;  %v298_v7 = vld [vmem:[%s1267_s1 + $0x10] sm:$0xff]  ;;  %v612_v9 = vld [vmem:[%s1270_s4 + $0x20] sm:$0xff]  ;;  %v299_v10 = vld [vmem:[%s1267_s1 + $0x18] sm:$0xff] }
  0x1e   : > { %882 = vmatprep.subr.bf16.mxu0 %v881_v24  ;;  %385 = vperm.xlu1 %961, %v323_v62   ;;  %v611_v11 = vld [vmem:[%s1270_s4 + $0x18] sm:$0xff]  ;;  %v614_v12 = vld [vmem:[%s1270_s4 + $0x30] sm:$0xff]  ;;  %v300_v13 = vld [vmem:[%s1267_s1 + $0x20] sm:$0xff] }
  0x1f   : > { %v613_v14 = vld [vmem:[%s1270_s4 + $0x28] sm:$0xff]  ;;  %v302_v16 = vld [vmem:[%s1267_s1 + $0x30] sm:$0xff]  ;;  %v303_v17 = vld [vmem:[%s1267_s1 + $0x38] sm:$0xff] }
  0x20   : > { %v301_v15 = vld [vmem:[%s1267_s1 + $0x28] sm:$0xff]  ;;  %v304_v18 = vld [vmem:[%s1267_s1 + $0x40] sm:$0xff]  ;;  %v306_v20 = vld [vmem:[%s1267_s1 + $0x50] sm:$0xff] }
  0x21   : > { %884 = vmatpush1.bf16.msra.mxu0 %v883_v31  ;;  %390 = vperm.xlu0 %960, %v324_v60   ;;  %v305_v19 = vld [vmem:[%s1267_s1 + $0x48] sm:$0xff]  ;;  %v307_v21 = vld [vmem:[%s1267_s1 + $0x58] sm:$0xff]  ;;  %v308_v22 = vld [vmem:[%s1267_s1 + $0x60] sm:$0xff] }
  0x22   : > { %886 = vmatprep.subr.bf16.mxu0 %v885_v33  ;;  %395 = vperm.xlu1 %961, %v325_v2   ;;  %v309_v23 = vld [vmem:[%s1267_s1 + $0x68] sm:$0xff]  ;;  %v310_v24 = vld [vmem:[%s1267_s1 + $0x70] sm:$0xff]  ;;  %v311_v25 = vld [vmem:[%s1267_s1 + $0x78] sm:$0xff] }
  0x25   : > { %888 = vmatpush1.bf16.msra.mxu0 %v887_v39  ;;  %400 = vperm.xlu0 %960, %v326_v63  }
  0x26   : > { %890 = vmatprep.subr.bf16.mxu0 %v889_v41  ;;  %405 = vperm.xlu1 %961, %v327_v5  }
  0x29   : > { %892 = vmatpush1.bf16.msra.mxu0 %v891_v47  ;;  %617 = vperm.xlu0 %960, %v608_v3  }
  0x2a   : > { %894 = vmatprep.subr.bf16.mxu0 %v893_v49  ;;  %622 = vperm.xlu1 %961, %v609_v8  }
  0x2d   : > { %896 = vmatpush1.bf16.msra.mxu0 %v895_v55  ;;  %627 = vperm.xlu0 %960, %v610_v6  }
  0x2e   : > { %898 = vmatprep.subr.bf16.mxu0 %v897_v57  ;;  %632 = vperm.xlu1 %961, %v611_v11  }
  0x31   : > { %900 = vmatpush1.bf16.msra.mxu0 %v899_v61  ;;  %637 = vperm.xlu0 %960, %v612_v9  }
  0x32   : > { %642 = vperm.xlu1 %961, %v613_v14  }
  0x34   : > { %473 = vmatmul.mubr.f32.vlgmr.msra.gmra.mrb[0].mxu0 %v296_v1 }
  0x35   : > { %478 = vmatprep.mubr.f32.mxu0 %v986_v0  ;;  %647 = vperm.xlu0 %960, %v614_v12  }
  0x38   : > { %479 = vmatmul.mubr.f32.gmra.mrb[2].mxu0 %v297_v4 }
  0x39   : > { %484 = vmatprep.mubr.f32.mxu0 %v986_v0 }
  0x3c   : > { %485 = vmatmul.mubr.f32.gmra.mrb[4].mxu0 %v298_v7 }
  0x3d   : > { %490 = vmatprep.mubr.f32.mxu0 %v986_v0 }
  0x40   : > { %491 = vmatmul.mubr.f32.gmra.mrb[6].mxu0 %v299_v10 }
  0x41   : > { %496 = vmatprep.mubr.f32.mxu0 %v986_v0 }
  0x44   : > { %497 = vmatmul.mubr.f32.gmra.mrb[8].mxu0 %v300_v13 }
  0x45   : > { %502 = vmatprep.mubr.f32.mxu0 %v986_v0 }
  0x48   : > { %503 = vmatmul.mubr.f32.gmra.mrb[10].mxu0 %v301_v15 }
  0x49   : > { %508 = vmatprep.mubr.f32.mxu0 %v986_v0 }
  0x4c   : > { %509 = vmatmul.mubr.f32.gmra.mrb[12].mxu0 %v302_v16 }
  0x4d   : > { %514 = vmatprep.mubr.f32.mxu0 %v986_v0 }
  0x50   : > { %515 = vmatmul.mubr.f32.gmra.mrb[14].mxu0 %v303_v17 }
  0x51   : > { %520 = vmatprep.mubr.f32.mxu0 %v986_v0 }
  0x54   : > { %521 = vmatmul.mubr.f32.gmra.mrb[16].mxu0 %v304_v18 }
  0x55   : > { %526 = vmatprep.mubr.f32.mxu0 %v986_v0 }
  0x58   : > { %527 = vmatmul.mubr.f32.gmra.mrb[18].mxu0 %v305_v19 }
  0x59   : > { %532 = vmatprep.mubr.f32.mxu0 %v986_v0 }
  0x5c   : > { %533 = vmatmul.mubr.f32.gmra.mrb[20].mxu0 %v306_v20 }
  0x5d   : > { %538 = vmatprep.mubr.f32.mxu0 %v986_v0 }
  0x60   : > { %539 = vmatmul.mubr.f32.gmra.mrb[22].mxu0 %v307_v21 }
  0x61   : > { %544 = vmatprep.mubr.f32.mxu0 %v986_v0 }
  0x64   : > { %545 = vmatmul.mubr.f32.gmra.mrb[24].mxu0 %v308_v22 }
  0x65   : > { %550 = vmatprep.mubr.f32.mxu0 %v986_v0 }
  0x68   : > { %551 = vmatmul.mubr.f32.gmra.mrb[26].mxu0 %v309_v23 }
  0x69   : > { %556 = vmatprep.mubr.f32.mxu0 %v986_v0 }
  0x6c   : > { %557 = vmatmul.mubr.f32.gmra.mrb[28].mxu0 %v310_v24 }
  0x6d   : > { %562 = vmatprep.mubr.f32.mxu0 %v986_v0 }
  0x70   : > { %563 = vmatmul.mubr.f32.gmra.mrb[30].mxu0 %v311_v25 }
  0x88   : > { %v331_v26 = vpop.permute.xlu0 %330  ;;  %v341_v35 = vpop.permute.xlu1 %340 }
  0x8c   : > { %v336_v30 = vpop.permute.xlu0 %335  ;;  %v346_v46 = vpop.permute.xlu1 %345 }
  0x90   : > { %v351_v59 = vpop.permute.xlu0 %350  ;;  %v356_v62 = vpop.permute.xlu1 %355 }
  0x94   : > { %v361_v12 = vpop.permute.xlu0 %360 }
  0x95   : > { %v366_v15 = vpop.permute.xlu1 %365 }
 0x107   : > { %v474_v27 = vpop.f32.mrb[0].mxu0 }
 0x108   : > { %v476_v28 = vpop.f32.mrb[1].mxu0  ;;  %v475_v29 = vadd.f32 %v474_v27, %v331_v26 }
 0x109   : > { %v477_v31 = vadd.f32 %v476_v28, %v331_v26  ;;  %v371_v28 = vpop.permute.xlu0 %370 }
 0x10a   : > { %v569_v37 = vmax.f32 %v475_v29, 0.0 }
 0x10b   : > { %v480_v32 = vpop.f32.mrb[2].mxu0  ;;  %v570_v39 = vmax.f32 %v477_v31, 0.0  ;;  %v376_v31 = vpop.permute.xlu1 %375 }
 0x10c   : > { %v481_v33 = vadd.f32 %v480_v32, %v336_v30  ;;  %v482_v34 = vpop.f32.mrb[3].mxu0 }
 0x10d   : > { %v483_v36 = vadd.f32 %v482_v34, %v336_v30 }
 0x10e   : > { %v571_v38 = vmax.f32 %v481_v33, 0.0 }
 0x10f   : > { %v572_v40 = vmax.f32 %v483_v36, 0.0  ;;  %v486_v41 = vpop.f32.mrb[4].mxu0 }
 0x110   : > { %v488_v42 = vpop.f32.mrb[5].mxu0  ;;  %v903_v43 = vpack.c.bf16 %v571_v38, %v569_v37  ;;  %v487_v45 = vadd.f32 %v486_v41, %v341_v35 }
 0x111   : > { %v901_v44 = vpack.c.bf16 %v572_v40, %v570_v39  ;;  %v489_v47 = vadd.f32 %v488_v42, %v341_v35 }
 0x112   : > { %v573_v52 = vmax.f32 %v487_v45, 0.0 }
 0x113   : > { %v492_v48 = vpop.f32.mrb[6].mxu0  ;;  %902 = vmatprep.subr.bf16.mxu1 %v901_v44  ;;  %v574_v54 = vmax.f32 %v489_v47, 0.0  ;;  %v381_v44 = vpop.permute.xlu0 %380 }
 0x114   : > { %v493_v49 = vadd.f32 %v492_v48, %v346_v46  ;;  %v494_v50 = vpop.f32.mrb[7].mxu0  ;;  %904 = vmatpush1.bf16.msra.mxu1 %v903_v43  ;;  %v386_v47 = vpop.permute.xlu1 %385 }
 0x115   : > { %v495_v51 = vadd.f32 %v494_v50, %v346_v46 }
 0x116   : > { %v575_v53 = vmax.f32 %v493_v49, 0.0 }
 0x117   : > { %v576_v55 = vmax.f32 %v495_v51, 0.0  ;;  %v498_v56 = vpop.f32.mrb[8].mxu0 }
 0x118   : > { %v907_v57 = vpack.c.bf16 %v575_v53, %v573_v52  ;;  %v500_v58 = vpop.f32.mrb[9].mxu0  ;;  %v499_v61 = vadd.f32 %v498_v56, %v351_v59 }
 0x119   : > { %v905_v60 = vpack.c.bf16 %v576_v55, %v574_v54  ;;  %v501_v63 = vadd.f32 %v500_v58, %v351_v59 }
 0x11a   : > { %v577_v5 = vmax.f32 %v499_v61, 0.0 }
 0x11b   : > { %v504_v1 = vpop.f32.mrb[10].mxu0  ;;  %906 = vmatprep.subr.bf16.mxu1 %v905_v60  ;;  %v578_v7 = vmax.f32 %v501_v63, 0.0  ;;  %v391_v60 = vpop.permute.xlu0 %390 }
 0x11c   : > { %v505_v2 = vadd.f32 %v504_v1, %v356_v62  ;;  %v506_v3 = vpop.f32.mrb[11].mxu0  ;;  %908 = vmatpush1.bf16.msra.mxu1 %v907_v57  ;;  %v396_v63 = vpop.permute.xlu1 %395 }
 0x11d   : > { %v507_v4 = vadd.f32 %v506_v3, %v356_v62 }
 0x11e   : > { %v579_v6 = vmax.f32 %v505_v2, 0.0 }
 0x11f   : > { %v580_v8 = vmax.f32 %v507_v4, 0.0  ;;  %v510_v9 = vpop.f32.mrb[12].mxu0 }
 0x120   : > { %v911_v10 = vpack.c.bf16 %v579_v6, %v577_v5  ;;  %v512_v11 = vpop.f32.mrb[13].mxu0  ;;  %v511_v14 = vadd.f32 %v510_v9, %v361_v12 }
 0x121   : > { %v909_v13 = vpack.c.bf16 %v580_v8, %v578_v7  ;;  %v513_v16 = vadd.f32 %v512_v11, %v361_v12 }
 0x122   : > { %v581_v21 = vmax.f32 %v511_v14, 0.0 }
 0x123   : > { %v516_v17 = vpop.f32.mrb[14].mxu0  ;;  %910 = vmatprep.subr.bf16.mxu1 %v909_v13  ;;  %v582_v23 = vmax.f32 %v513_v16, 0.0  ;;  %v401_v13 = vpop.permute.xlu0 %400 }
 0x124   : > { %v517_v18 = vadd.f32 %v516_v17, %v366_v15  ;;  %v518_v19 = vpop.f32.mrb[15].mxu0  ;;  %912 = vmatpush1.bf16.msra.mxu1 %v911_v10  ;;  %v406_v16 = vpop.permute.xlu1 %405 }
 0x125   : > { %v519_v20 = vadd.f32 %v518_v19, %v366_v15 }
 0x126   : > { %v583_v22 = vmax.f32 %v517_v18, 0.0 }
 0x127   : > { %v584_v24 = vmax.f32 %v519_v20, 0.0  ;;  %v522_v25 = vpop.f32.mrb[16].mxu0 }
 0x128   : > { %v915_v26 = vpack.c.bf16 %v583_v22, %v581_v21  ;;  %v524_v27 = vpop.f32.mrb[17].mxu0  ;;  %v523_v30 = vadd.f32 %v522_v25, %v371_v28 }
 0x129   : > { %v913_v29 = vpack.c.bf16 %v584_v24, %v582_v23  ;;  %v525_v32 = vadd.f32 %v524_v27, %v371_v28  ;;  %v601_v28 = vld [vmem:[%s1269_s3] sm:$0xff] }
 0x12a   : > { %v585_v37 = vmax.f32 %v523_v30, 0.0  ;;  %v603_v30 = vld [vmem:[%s1269_s3 + $0x10] sm:$0xff] }
 0x12b   : > { %v528_v33 = vpop.f32.mrb[18].mxu0  ;;  %914 = vmatprep.subr.bf16.mxu1 %v913_v29  ;;  %v586_v39 = vmax.f32 %v525_v32, 0.0  ;;  %v602_v29 = vld [vmem:[%s1269_s3 + $0x8] sm:$0xff]  ;;  %v605_v32 = vld [vmem:[%s1269_s3 + $0x20] sm:$0xff] }
 0x12c   : > { %v529_v34 = vadd.f32 %v528_v33, %v376_v31  ;;  %v530_v35 = vpop.f32.mrb[19].mxu0  ;;  %916 = vmatpush1.bf16.msra.mxu1 %v915_v26  ;;  %v606_v33 = vld [vmem:[%s1269_s3 + $0x28] sm:$0xff] }
 0x12d   : > { %v531_v36 = vadd.f32 %v530_v35, %v376_v31  ;;  %v604_v31 = vld [vmem:[%s1269_s3 + $0x18] sm:$0xff]  ;;  %v618_v35 = vpop.permute.xlu0 %617 }
 0x12e   : > { %v587_v38 = vmax.f32 %v529_v34, 0.0  ;;  %v607_v34 = vld [vmem:[%s1269_s3 + $0x30] sm:$0xff] }
 0x12f   : > { %v588_v40 = vmax.f32 %v531_v36, 0.0  ;;  %v534_v41 = vpop.f32.mrb[20].mxu0 }
 0x130   : > { %v919_v42 = vpack.c.bf16 %v587_v38, %v585_v37  ;;  %v536_v43 = vpop.f32.mrb[21].mxu0  ;;  %v535_v46 = vadd.f32 %v534_v41, %v381_v44 }
 0x131   : > { %v917_v45 = vpack.c.bf16 %v588_v40, %v586_v39  ;;  %v537_v48 = vadd.f32 %v536_v43, %v381_v44  ;;  %v623_v39 = vpop.permute.xlu1 %622  ;;  %v628_v44 = vpop.permute.xlu0 %627 }
 0x132   : > { %v589_v53 = vmax.f32 %v535_v46, 0.0 }
 0x133   : > { %v540_v49 = vpop.f32.mrb[22].mxu0  ;;  %918 = vmatprep.subr.bf16.mxu1 %v917_v45  ;;  %v590_v55 = vmax.f32 %v537_v48, 0.0 }
 0x134   : > { %v541_v50 = vadd.f32 %v540_v49, %v386_v47  ;;  %v542_v51 = vpop.f32.mrb[23].mxu0  ;;  %920 = vmatpush1.bf16.msra.mxu1 %v919_v42 }
 0x135   : > { %v543_v52 = vadd.f32 %v542_v51, %v386_v47  ;;  %v633_v49 = vpop.permute.xlu1 %632 }
 0x136   : > { %v591_v54 = vmax.f32 %v541_v50, 0.0 }
 0x137   : > { %v592_v56 = vmax.f32 %v543_v52, 0.0  ;;  %v546_v57 = vpop.f32.mrb[24].mxu0 }
 0x138   : > { %v923_v58 = vpack.c.bf16 %v591_v54, %v589_v53  ;;  %v548_v59 = vpop.f32.mrb[25].mxu0  ;;  %v547_v62 = vadd.f32 %v546_v57, %v391_v60  ;;  %v638_v54 = vpop.permute.xlu0 %637 }
 0x139   : > { %v921_v61 = vpack.c.bf16 %v592_v56, %v590_v55  ;;  %v549_v1 = vadd.f32 %v548_v59, %v391_v60  ;;  %v643_v59 = vpop.permute.xlu1 %642 }
 0x13a   : > { %v593_v6 = vmax.f32 %v547_v62, 0.0 }
 0x13b   : > { %v552_v2 = vpop.f32.mrb[26].mxu0  ;;  %922 = vmatprep.subr.bf16.mxu1 %v921_v61  ;;  %v594_v8 = vmax.f32 %v549_v1, 0.0 }
 0x13c   : > { %v553_v3 = vadd.f32 %v552_v2, %v396_v63  ;;  %v554_v4 = vpop.f32.mrb[27].mxu0  ;;  %924 = vmatpush1.bf16.msra.mxu1 %v923_v58  ;;  %v648_v1 = vpop.permute.xlu0 %647 }
 0x13d   : > { %v555_v5 = vadd.f32 %v554_v4, %v396_v63 }
 0x13e   : > { %v595_v7 = vmax.f32 %v553_v3, 0.0 }
 0x13f   : > { %v596_v9 = vmax.f32 %v555_v5, 0.0  ;;  %v558_v10 = vpop.f32.mrb[28].mxu0 }
 0x140   : > { %v927_v11 = vpack.c.bf16 %v595_v7, %v593_v6  ;;  %v560_v12 = vpop.f32.mrb[29].mxu0  ;;  %v559_v15 = vadd.f32 %v558_v10, %v401_v13 }
 0x141   : > { %v925_v14 = vpack.c.bf16 %v596_v9, %v594_v8  ;;  %v561_v17 = vadd.f32 %v560_v12, %v401_v13 }
 0x142   : > { %v597_v22 = vmax.f32 %v559_v15, 0.0 }
 0x143   : > { %v564_v18 = vpop.f32.mrb[30].mxu0  ;;  %926 = vmatprep.subr.bf16.mxu1 %v925_v14  ;;  %v598_v24 = vmax.f32 %v561_v17, 0.0 }
 0x144   : > { %v565_v19 = vadd.f32 %v564_v18, %v406_v16  ;;  %v566_v20 = vpop.f32.mrb[31].mxu0  ;;  %928 = vmatpush1.bf16.msra.mxu1 %v927_v11 }
 0x145   : > { %v567_v21 = vadd.f32 %v566_v20, %v406_v16 }
 0x146   : > { %v599_v23 = vmax.f32 %v565_v19, 0.0 }
 0x147   : > { %v600_v25 = vmax.f32 %v567_v21, 0.0 }
 0x148   : > { %v931_v26 = vpack.c.bf16 %v599_v23, %v597_v22 }
 0x149   : > { %v929_v27 = vpack.c.bf16 %v600_v25, %v598_v24 }
 0x14b   : > { %930 = vmatprep.subr.bf16.mxu1 %v929_v27 }
 0x14c   : > { %932 = vmatpush1.bf16.msra.mxu1 %v931_v26 }
 0x14f   : > { %715 = vmatmul.mubr.f32.vlgmr.msra.gmra.mrb[0].mxu1 %v601_v28 }
 0x150   : > { %720 = vmatprep.mubr.f32.mxu1 %v986_v0 }
 0x153   : > { %721 = vmatmul.mubr.f32.gmra.mrb[2].mxu1 %v602_v29 }
 0x154   : > { %726 = vmatprep.mubr.f32.mxu1 %v986_v0 }
 0x157   : > { %727 = vmatmul.mubr.f32.gmra.mrb[4].mxu1 %v603_v30 }
 0x158   : > { %732 = vmatprep.mubr.f32.mxu1 %v986_v0 }
 0x15b   : > { %733 = vmatmul.mubr.f32.gmra.mrb[6].mxu1 %v604_v31 }
 0x15c   : > { %738 = vmatprep.mubr.f32.mxu1 %v986_v0 }
 0x15f   : > { %739 = vmatmul.mubr.f32.gmra.mrb[8].mxu1 %v605_v32 }
 0x160   : > { %744 = vmatprep.mubr.f32.mxu1 %v986_v0 }
 0x163   : > { %745 = vmatmul.mubr.f32.gmra.mrb[10].mxu1 %v606_v33 }
 0x164   : > { %750 = vmatprep.mubr.f32.mxu1 %v986_v0 }
 0x167   : > { %751 = vmatmul.mubr.f32.gmra.mrb[12].mxu1 %v607_v34 }
 0x222   : > { %v716_v36 = vpop.f32.mrb[0].mxu1 }
 0x223   : > { %v717_v37 = vadd.f32 %v716_v36, %v618_v35  ;;  %v718_v38 = vpop.f32.mrb[1].mxu1 }
 0x224   : > { %v719_v0 = vadd.f32 %v718_v38, %v618_v35 }
 0x225   : > { %757 = vst [vmem:[%s1241_s12] sm:$0xff] %v717_v37 }
 0x226   : > { %758 = vst [vmem:[%s1241_s12 + $0x8] sm:$0xff] %v719_v0  ;;  %v722_v40 = vpop.f32.mrb[2].mxu1 }
 0x227   : > { %v723_v41 = vadd.f32 %v722_v40, %v623_v39  ;;  %v724_v42 = vpop.f32.mrb[3].mxu1 }
 0x228   : > { %v725_v43 = vadd.f32 %v724_v42, %v623_v39 }
 0x229   : > { %759 = vst [vmem:[%s1241_s12 + $0x10] sm:$0xff] %v723_v41 }
 0x22a   : > { %760 = vst [vmem:[%s1241_s12 + $0x18] sm:$0xff] %v725_v43  ;;  %v728_v45 = vpop.f32.mrb[4].mxu1 }
 0x22b   : > { %v729_v46 = vadd.f32 %v728_v45, %v628_v44  ;;  %v730_v47 = vpop.f32.mrb[5].mxu1 }
 0x22c   : > { %v731_v48 = vadd.f32 %v730_v47, %v628_v44 }
 0x22d   : > { %761 = vst [vmem:[%s1241_s12 + $0x20] sm:$0xff] %v729_v46 }
 0x22e   : > { %762 = vst [vmem:[%s1241_s12 + $0x28] sm:$0xff] %v731_v48  ;;  %v734_v50 = vpop.f32.mrb[6].mxu1 }
 0x22f   : > { %v735_v51 = vadd.f32 %v734_v50, %v633_v49  ;;  %v736_v52 = vpop.f32.mrb[7].mxu1 }
 0x230   : > { %v737_v53 = vadd.f32 %v736_v52, %v633_v49 }
 0x231   : > { %763 = vst [vmem:[%s1241_s12 + $0x30] sm:$0xff] %v735_v51 }
 0x232   : > { %764 = vst [vmem:[%s1241_s12 + $0x38] sm:$0xff] %v737_v53  ;;  %v740_v55 = vpop.f32.mrb[8].mxu1 }
 0x233   : > { %v741_v56 = vadd.f32 %v740_v55, %v638_v54  ;;  %v742_v57 = vpop.f32.mrb[9].mxu1 }
 0x234   : > { %v743_v58 = vadd.f32 %v742_v57, %v638_v54 }
 0x235   : > { %765 = vst [vmem:[%s1241_s12 + $0x40] sm:$0xff] %v741_v56 }
 0x236   : > { %766 = vst [vmem:[%s1241_s12 + $0x48] sm:$0xff] %v743_v58  ;;  %v746_v60 = vpop.f32.mrb[10].mxu1 }
 0x237   : > { %v747_v61 = vadd.f32 %v746_v60, %v643_v59  ;;  %v748_v62 = vpop.f32.mrb[11].mxu1 }
 0x238   : > { %v749_v63 = vadd.f32 %v748_v62, %v643_v59 }
 0x239   : > { %767 = vst [vmem:[%s1241_s12 + $0x50] sm:$0xff] %v747_v61 }
 0x23a   : > { %768 = vst [vmem:[%s1241_s12 + $0x58] sm:$0xff] %v749_v63  ;;  %v752_v2 = vpop.f32.mrb[12].mxu1 }
 0x23b   : > { %v753_v3 = vadd.f32 %v752_v2, %v648_v1  ;;  %v754_v4 = vpop.f32.mrb[13].mxu1 }
 0x23c   : > { %v755_v5 = vadd.f32 %v754_v4, %v648_v1 }
 0x23d   : > { %769 = vst [vmem:[%s1241_s12 + $0x60] sm:$0xff] %v753_v3 }
 0x23e   : > { %770 = vst [vmem:[%s1241_s12 + $0x68] sm:$0xff] %v755_v5 }
 0x23f PF: > { %s15_s20 = sadd.s32 1, %s984_s20   ;;  %s1272_s18 = smov %s980_s19 }
 0x240   : > { %p12_p5 = scmp.ge.s32.totalorder %s15_s20, 4   ;;  %s1273_s19 = smov %s1275_s21 }
 0x242   :  { %14 = sbr.rel (!%p12_p5) target bundleno = 2 (0x2), region = 70 }

</bundles_post_ra>
